<compile_context>
chip_gen: v7x
topology: tpu7x:2x2x1
jax: 0.10.0
libtpu: 0.0.40
codegen_flags: <defaults>
</compile_context>

<pallas_src>
import functools

import jax
import jax.numpy as jnp
from jax import lax
from jax.experimental import pallas as pl
from jax.experimental.pallas import tpu as pltpu

LANES = 128
SUBLANES = 8
MAX_BLOCK_ROWS = 4096   # (4096, 128) f32 = 2 MiB per stream per grid step


def _focal_partial_kernel(info_ref, x_ref, y_ref, out_ref, *,
                          alpha, gamma, per_core, block_elems, binary_targets):
    """Accumulate an (8, 128) partial sum of focal-loss terms per core."""
    c = pl.program_id(0)
    i = pl.program_id(1)

    @pl.when(i == 0)
    def _():
        out_ref[...] = jnp.zeros_like(out_ref)

    x = x_ref[...].astype(jnp.float32)
    y = y_ref[...].astype(jnp.float32)
    rows, lanes = x.shape

    # Numerically stable BCE-with-logits (PyTorch formulation).
    e = jnp.exp(-jnp.abs(x))
    xy = x * y
    relu_x = jnp.maximum(x, 0.0)
    bce = relu_x - xy + jnp.log1p(e)

    if binary_targets:
        # For y in {0, 1}: exp(x*y - max(x,0)) is either 1 or e, so pt needs no
        # extra exp -- a cheap approximate reciprocal instead (EUP: 3 -> 2
        # transcendentals per element).
        num = jnp.where(xy - relu_x == 0.0, 1.0, e)
        pt = num * pl.reciprocal(1.0 + e, approx=True)
    else:
        pt = jnp.exp(-bce)
    t = 1.0 - pt

    # Integer gamma -> repeated multiplies (avoids pow = exp(gamma*log) on EUP).
    g = float(gamma)
    if g == int(g) and 0 <= int(g) <= 8:
        gi = int(g)
        w = None if gi == 0 else t
        for _ in range(max(gi - 1, 0)):
            w = w * t
    else:
        w = t ** g
    f_loss = alpha * bce if w is None else (alpha * w) * bce

    # Per-block valid-element count: full for interior blocks, the ragged tail
    # for the last block, 0 for the (at most ncores-1) clamped overhang blocks.
    gb = c * per_core + i                       # global block index (small int32)
    last_block = info_ref[0]
    tail_valid = info_ref[1]
    valid_count = jnp.where(
        gb < last_block, jnp.int32(block_elems),
        jnp.where(gb == last_block, tail_valid, jnp.int32(0)))

    def _accumulate(v):
        # VALU-only partial reduction onto the VMEM-resident (1, 8, 128) block.
        partial = jnp.sum(v.reshape(rows // SUBLANES, SUBLANES, lanes), axis=0)
        out_ref[...] = out_ref[...] + partial[None, :, :]

    # Fast path: fully-valid block -> no iota/compare/select work at all.
    @pl.when(valid_count == block_elems)
    def _():
        _accumulate(f_loss)

    # Slow path: only the block holding the ragged tail (plus any overhang
    # block from the core split) pays for the mask.
    @pl.when(valid_count < block_elems)
    def _():
        rid = lax.broadcasted_iota(jnp.int32, f_loss.shape, 0)
        lid = lax.broadcasted_iota(jnp.int32, f_loss.shape, 1)
        local_idx = rid * lanes + lid           # block-local: no int32 overflow
        _accumulate(jnp.where(local_idx < valid_count, f_loss, 0.0))


def _round_up(a, b):
    return pl.cdiv(a, b) * b


def _sublane_multiple(dtype):
    """Min sublane tile for the dtype: 8 (32-bit), 16 (16-bit), 32 (8-bit)."""
    itemsize = jnp.dtype(dtype).itemsize
    if itemsize >= 4:
        return 8
    if itemsize == 2:
        return 16
    return 32


def _tensorcores_per_chip():
    """Best-effort TensorCore count per JAX device (v5e/v6e: 1, v7x/v4: 2)."""
    try:
        info = pltpu.get_tpu_info()
        for name in ("num_cores", "num_tensorcores", "tensorcore_count",
                     "core_count", "cores_per_chip", "num_cores_per_chip"):
            v = getattr(info, name, None)
            if isinstance(v, int) and v > 0:
                return v
    except Exception:
        pass
    try:
        dev = jax.devices()[0]
        v = getattr(dev, "num_cores", None)
        if isinstance(v, int) and v > 0:
            return v
        kind = str(getattr(dev, "device_kind", "")).lower()
        if "v7" in kind or "7x" in kind or "v4" in kind:
            return 2
    except Exception:
        pass
    return 1


def _focal_sum_jax(x, y, alpha, gamma):
    """Exact pure-JAX focal-loss sum (used only for the <128-element tail)."""
    x = x.astype(jnp.float32)
    y = y.astype(jnp.float32)
    bce = jnp.maximum(x, 0.0) - x * y + jnp.log1p(jnp.exp(-jnp.abs(x)))
    pt = jnp.exp(-bce)
    return jnp.sum(alpha * (1.0 - pt) ** gamma * bce)


def focal_loss(inputs, targets, alpha=0.25, gamma=2.0, reduction="mean",
               binary_targets=False):
    """Pallas TPU implementation of FocalLoss.forward."""
    assert inputs.shape == targets.shape
    n = int(inputs.size)

    x = inputs.reshape(-1)
    y = targets.reshape(-1)

    rem = n % LANES
    main_n = n - rem

    total = jnp.float32(0.0)
    if rem:
        # TODO(synk): a fully zero-copy ragged tail would need a manual DMA of
        # the exact extent (memory_space=pl.ANY); it is <128 elements, so a
        # tiny pure-JAX epilogue is used instead.
        total = total + _focal_sum_jax(x[main_n:], y[main_n:], alpha, gamma)

    if main_n:
        xm = x if rem == 0 else x[:main_n]
        ym = y if rem == 0 else y[:main_n]
        rows = main_n // LANES
        xm = xm.reshape(rows, LANES)
        ym = ym.reshape(rows, LANES)

        sub = max(_sublane_multiple(inputs.dtype), _sublane_multiple(targets.dtype))
        block_rows = min(MAX_BLOCK_ROWS, _round_up(rows, sub))
        nblocks = pl.cdiv(rows, block_rows)
        ncores = max(1, min(_tensorcores_per_chip(), nblocks))
        per_core = pl.cdiv(nblocks, ncores)
        block_elems = block_rows * LANES
        last_block = nblocks - 1
        tail_valid = main_n - last_block * block_elems   # in (0, block_elems]
        info = jnp.array([last_block, tail_valid], dtype=jnp.int32)

        kernel = functools.partial(
            _focal_partial_kernel,
            alpha=float(alpha), gamma=float(gamma),
            per_core=int(per_core), block_elems=int(block_elems),
            binary_targets=bool(binary_targets))

        def in_map(c, i, info_ref):
            # Clamp the (at most ncores-1) overhang block indices; their
            # contribution is masked to zero inside the kernel.
            return (jnp.minimum(c * per_core + i, last_block), 0)

        in_spec = pl.BlockSpec((block_rows, LANES), in_map)
        out_spec = pl.BlockSpec((1, SUBLANES, LANES),
                                lambda c, i, info_ref: (c, 0, 0))

        def run(dim_sem):
            return pl.pallas_call(
                kernel,
                out_shape=jax.ShapeDtypeStruct((ncores, SUBLANES, LANES),
                                               jnp.float32),
                grid_spec=pltpu.PrefetchScalarGridSpec(
                    num_scalar_prefetch=1,
                    grid=(ncores, per_core),
                    in_specs=[in_spec, in_spec],
                    out_specs=out_spec,
                ),
                compiler_params=pltpu.CompilerParams(
                    dimension_semantics=dim_sem),
            )(info, xm, ym)

        if ncores > 1:
            try:
                # Guaranteed per-TensorCore sharding of the reduction (v7x).
                partials = run((pltpu.CORE_PARALLEL, pltpu.ARBITRARY))
            except Exception:
                partials = run(("parallel", "arbitrary"))
        else:
            partials = run(("arbitrary", "arbitrary"))

        total = total + jnp.sum(partials)

    if reduction == "mean":
        return total / jnp.float32(n)
    return total


def _focal_loss_ref(inputs, targets, alpha=0.25, gamma=2.0, reduction="mean"):
    """Pure-JAX reference for validation."""
    x = inputs.astype(jnp.float32)
    y = targets.astype(jnp.float32)
    bce = jnp.maximum(x, 0.0) - x * y + jnp.log1p(jnp.exp(-jnp.abs(x)))
    pt = jnp.exp(-bce)
    f_loss = alpha * (1.0 - pt) ** gamma * bce
    return jnp.mean(f_loss) if reduction == "mean" else jnp.sum(f_loss)


if __name__ == "__main__":
    key = jax.random.PRNGKey(0)
    kx, ky = jax.random.split(key)

    # Small NCHW-shaped inputs consistent with a segmentation-style usage.
    shape = (2, 4, 16, 16)
    logits = jax.random.normal(kx, shape, dtype=jnp.float32)
    targets = (jax.random.uniform(ky, shape) > 0.5).astype(jnp.float32)

    # 1) Exact path, mean reduction.
    out_mean = jax.block_until_ready(focal_loss(logits, targets))
    ref_mean = _focal_loss_ref(logits, targets)
    assert jnp.allclose(out_mean, ref_mean, rtol=1e-5, atol=1e-6), (out_mean, ref_mean)

    # 2) Exact path, sum reduction.
    out_sum = jax.block_until_ready(focal_loss(logits, targets, reduction="sum"))
    ref_sum = _focal_loss_ref(logits, targets, reduction="sum")
    assert jnp.allclose(out_sum, ref_sum, rtol=1e-5, atol=1e-4), (out_sum, ref_sum)

    # 3) Lane-unaligned shape: exercises the masked last block and the pure-JAX
    #    ragged tail (no full-array padding anywhere).
    shape2 = (2, 3, 7, 11)
    logits2 = jax.random.normal(kx, shape2, dtype=jnp.float32)
    targets2 = (jax.random.uniform(ky, shape2) > 0.5).astype(jnp.float32)
    out2 = jax.block_until_ready(focal_loss(logits2, targets2))
    ref2 = _focal_loss_ref(logits2, targets2)
    assert jnp.allclose(out2, ref2, rtol=1e-5, atol=1e-6), (out2, ref2)

    # 4) bf16 inputs: dtype-aware sublane rounding + in-kernel f32 cast.
    logits_bf16 = logits.astype(jnp.bfloat16)
    targets_bf16 = targets.astype(jnp.bfloat16)
    out_bf16 = jax.block_until_ready(focal_loss(logits_bf16, targets_bf16))
    ref_bf16 = _focal_loss_ref(logits_bf16, targets_bf16)
    assert jnp.allclose(out_bf16, ref_bf16, rtol=1e-4, atol=1e-5), (out_bf16, ref_bf16)

    # 5) Binary-target fast path (one fewer exp per element, approx reciprocal
    #    shifts last-bit numerics -> loose tolerance).
    out_bin = jax.block_until_ready(focal_loss(logits, targets, binary_targets=True))
    assert jnp.allclose(out_bin, ref_mean, rtol=2e-2, atol=1e-4), (out_bin, ref_mean)

    print("KERNEL_OK")
</pallas_src>

<mosaic_0001>
module attributes {stable_mosaic.version = 11 : i64} {
  func.func @_focal_partial_kernel(%arg0: i32, %arg1: i32, %arg2: memref<2xi32, #tpu.memory_space<smem>>, %arg3: memref<16x128xf32, #tpu.memory_space<vmem>>, %arg4: memref<16x128xf32, #tpu.memory_space<vmem>>, %arg5: memref<1x8x128xf32, #tpu.memory_space<vmem>>) attributes {dimension_semantics = [#tpu.dimension_semantics<arbitrary>, #tpu.dimension_semantics<arbitrary>], iteration_bounds = array<i64: 1, 1>, scalar_prefetch = 1 : i64, scratch_operands = 0 : i64, tpu.core_type = #tpu.core_type<tc>, window_params = [{transform_indices = @transform_0, window_bounds = array<i64: 16, 128>}, {transform_indices = @transform_1, window_bounds = array<i64: 16, 128>}, {transform_indices = @transform_2, window_bounds = array<i64: 1, 8, 128>}]} {
    %c0_i32 = arith.constant 0 : i32
    %0 = arith.cmpi eq, %arg1, %c0_i32 : i32
    %1 = arith.extui %0 : i1 to i32
    %c0_i32_0 = arith.constant 0 : i32
    %2 = arith.cmpi ne, %1, %c0_i32_0 : i32
    scf.if %2 {
      %cst_14 = arith.constant 0.000000e+00 : f32
      %38 = vector.broadcast %cst_14 : f32 to vector<1x8x128xf32>
      %c0_15 = arith.constant 0 : index
      %c0_16 = arith.constant 0 : index
      %c0_17 = arith.constant 0 : index
      %39 = vector.load %arg5[%c0_15, %c0_16, %c0_17] : memref<1x8x128xf32, #tpu.memory_space<vmem>>, vector<1x8x128xf32>
      tpu.vector_store %arg5[%c0_15, %c0_16, %c0_17], %38 {strides = array<i32>} : memref<1x8x128xf32, #tpu.memory_space<vmem>>, vector<1x8x128xf32>,
    } else {
    }
    %c0 = arith.constant 0 : index
    %c0_1 = arith.constant 0 : index
    %3 = vector.load %arg3[%c0, %c0_1] : memref<16x128xf32, #tpu.memory_space<vmem>>, vector<16x128xf32>
    %c0_2 = arith.constant 0 : index
    %c0_3 = arith.constant 0 : index
    %4 = vector.load %arg4[%c0_2, %c0_3] : memref<16x128xf32, #tpu.memory_space<vmem>>, vector<16x128xf32>
    %5 = math.absf %3 : vector<16x128xf32>
    %cst = arith.constant 0.000000e+00 : f32
    %6 = vector.broadcast %cst : f32 to vector<16x128xf32>
    %7 = arith.subf %6, %5 : vector<16x128xf32>
    %8 = math.exp %7 : vector<16x128xf32>
    %9 = arith.mulf %3, %4 : vector<16x128xf32>
    %cst_4 = arith.constant 0.000000e+00 : f32
    %10 = vector.broadcast %cst_4 : f32 to vector<16x128xf32>
    %11 = arith.maximumf %3, %10 : vector<16x128xf32>
    %12 = arith.subf %11, %9 : vector<16x128xf32>
    %13 = math.log1p %8 : vector<16x128xf32>
    %14 = arith.addf %12, %13 : vector<16x128xf32>
    %cst_5 = arith.constant 0.000000e+00 : f32
    %15 = vector.broadcast %cst_5 : f32 to vector<16x128xf32>
    %16 = arith.subf %15, %14 : vector<16x128xf32>
    %17 = math.exp %16 : vector<16x128xf32>
    %cst_6 = arith.constant 1.000000e+00 : f32
    %18 = vector.broadcast %cst_6 : f32 to vector<16x128xf32>
    %19 = arith.subf %18, %17 : vector<16x128xf32>
    %20 = arith.mulf %19, %19 : vector<16x128xf32>
    %cst_7 = arith.constant 2.500000e-01 : f32
    %21 = vector.broadcast %cst_7 : f32 to vector<16x128xf32>
    %22 = arith.mulf %21, %20 : vector<16x128xf32>
    %23 = arith.mulf %22, %14 : vector<16x128xf32>
    %c1_i32 = arith.constant 1 : i32
    %24 = arith.muli %arg0, %c1_i32 : i32
    %25 = arith.addi %24, %arg1 : i32
    %c0_8 = arith.constant 0 : index
    %26 = memref.load %arg2[%c0_8] : memref<2xi32, #tpu.memory_space<smem>>
    %c1 = arith.constant 1 : index
    %27 = memref.load %arg2[%c1] : memref<2xi32, #tpu.memory_space<smem>>
    %28 = arith.cmpi slt, %25, %26 : i32
    %29 = arith.cmpi eq, %25, %26 : i32
    %c0_i32_9 = arith.constant 0 : i32
    %30 = arith.select %29, %27, %c0_i32_9 : i32
    %c2048_i32 = arith.constant 2048 : i32
    %31 = arith.select %28, %c2048_i32, %30 : i32
    %c2048_i32_10 = arith.constant 2048 : i32
    %32 = arith.cmpi eq, %31, %c2048_i32_10 : i32
    %33 = arith.extui %32 : i1 to i32
    %c0_i32_11 = arith.constant 0 : i32
    %34 = arith.cmpi ne, %33, %c0_i32_11 : i32
    scf.if %34 {
      %38 = vector.shape_cast %23 : vector<16x128xf32> to vector<2x8x128xf32>
      %cst_14 = arith.constant dense<0.000000e+00> : vector<8x128xf32>
      %39 = vector.multi_reduction <add>, %38, %cst_14 [0] : vector<2x8x128xf32> to vector<8x128xf32>
      %c0_15 = arith.constant 0 : index
      %c0_16 = arith.constant 0 : index
      %c0_17 = arith.constant 0 : index
      %40 = vector.load %arg5[%c0_15, %c0_16, %c0_17] : memref<1x8x128xf32, #tpu.memory_space<vmem>>, vector<1x8x128xf32>
      %41 = vector.shape_cast %39 : vector<8x128xf32> to vector<1x8x128xf32>
      %42 = arith.addf %40, %41 : vector<1x8x128xf32>
      %c0_18 = arith.constant 0 : index
      %c0_19 = arith.constant 0 : index
      %c0_20 = arith.constant 0 : index
      %43 = vector.load %arg5[%c0_18, %c0_19, %c0_20] : memref<1x8x128xf32, #tpu.memory_space<vmem>>, vector<1x8x128xf32>
      tpu.vector_store %arg5[%c0_18, %c0_19, %c0_20], %42 {strides = array<i32>} : memref<1x8x128xf32, #tpu.memory_space<vmem>>, vector<1x8x128xf32>,
    } else {
    }
    %c2048_i32_12 = arith.constant 2048 : i32
    %35 = arith.cmpi slt, %31, %c2048_i32_12 : i32
    %36 = arith.extui %35 : i1 to i32
    %c0_i32_13 = arith.constant 0 : i32
    %37 = arith.cmpi ne, %36, %c0_i32_13 : i32
    scf.if %37 {
      %38 = tpu.iota {dimensions = array<i32: 0>} : vector<16x128xi32>
      %39 = tpu.iota {dimensions = array<i32: 1>} : vector<16x128xi32>
      %c128_i32 = arith.constant 128 : i32
      %40 = vector.broadcast %c128_i32 : i32 to vector<16x128xi32>
      %41 = arith.muli %38, %40 : vector<16x128xi32>
      %42 = arith.addi %41, %39 : vector<16x128xi32>
      %43 = vector.broadcast %31 : i32 to vector<16x128xi32>
      %44 = arith.cmpi slt, %42, %43 : vector<16x128xi32>
      %cst_14 = arith.constant 0.000000e+00 : f32
      %45 = vector.broadcast %cst_14 : f32 to vector<16x128xf32>
      %46 = arith.select %44, %23, %45 : vector<16x128xi1>, vector<16x128xf32>
      %47 = vector.shape_cast %46 : vector<16x128xf32> to vector<2x8x128xf32>
      %cst_15 = arith.constant dense<0.000000e+00> : vector<8x128xf32>
      %48 = vector.multi_reduction <add>, %47, %cst_15 [0] : vector<2x8x128xf32> to vector<8x128xf32>
      %c0_16 = arith.constant 0 : index
      %c0_17 = arith.constant 0 : index
      %c0_18 = arith.constant 0 : index
      %49 = vector.load %arg5[%c0_16, %c0_17, %c0_18] : memref<1x8x128xf32, #tpu.memory_space<vmem>>, vector<1x8x128xf32>
      %50 = vector.shape_cast %48 : vector<8x128xf32> to vector<1x8x128xf32>
      %51 = arith.addf %49, %50 : vector<1x8x128xf32>
      %c0_19 = arith.constant 0 : index
      %c0_20 = arith.constant 0 : index
      %c0_21 = arith.constant 0 : index
      %52 = vector.load %arg5[%c0_19, %c0_20, %c0_21] : memref<1x8x128xf32, #tpu.memory_space<vmem>>, vector<1x8x128xf32>
      tpu.vector_store %arg5[%c0_19, %c0_20, %c0_21], %51 {strides = array<i32>} : memref<1x8x128xf32, #tpu.memory_space<vmem>>, vector<1x8x128xf32>,
    } else {
    }
    return
  }
  func.func @transform_0(%arg0: i32, %arg1: i32, %arg2: memref<2xi32, #tpu.memory_space<smem>>) -> (i32, i32) {
    %c1_i32 = arith.constant 1 : i32
    %0 = arith.muli %arg0, %c1_i32 : i32
    %1 = arith.addi %0, %arg1 : i32
    %c0_i32 = arith.constant 0 : i32
    %2 = arith.minsi %1, %c0_i32 : i32
    %c0_i32_0 = arith.constant 0 : i32
    %c0_i32_1 = arith.constant 0 : i32
    return %2, %c0_i32_0 : i32, i32
  }
  func.func @transform_1(%arg0: i32, %arg1: i32, %arg2: memref<2xi32, #tpu.memory_space<smem>>) -> (i32, i32) {
    %c1_i32 = arith.constant 1 : i32
    %0 = arith.muli %arg0, %c1_i32 : i32
    %1 = arith.addi %0, %arg1 : i32
    %c0_i32 = arith.constant 0 : i32
    %2 = arith.minsi %1, %c0_i32 : i32
    %c0_i32_0 = arith.constant 0 : i32
    %c0_i32_1 = arith.constant 0 : i32
    return %2, %c0_i32_0 : i32, i32
  }
  func.func @transform_2(%arg0: i32, %arg1: i32, %arg2: memref<2xi32, #tpu.memory_space<smem>>) -> (i32, i32, i32) {
    %c0_i32 = arith.constant 0 : i32
    %c0_i32_0 = arith.constant 0 : i32
    %c0_i32_1 = arith.constant 0 : i32
    return %arg0, %c0_i32, %c0_i32_0 : i32, i32, i32
  }
}

</mosaic_0001>

<bundles_post_ra>
// kernel: tpu_custom_call.1
= control target key start
LH: loop header
LB: loop body
LE: loop exit
PB: predicated region body
PF: predicated region fallthrough
CT: control target
= control target key end

     0   :  { %s367_s0 = inlined_call_operand.hbm [shape: s32[2], index: 0, kind: input, shape index: {}]   ;;  %s368_s1 = inlined_call_operand.hbm [shape: f32[16,128], index: 1, kind: input, shape index: {}]   ;;  %s369_s2 = inlined_call_operand.hbm [shape: f32[16,128], index: 2, kind: input, shape index: {}]   ;;  %s370_s3 = inlined_call_operand.hbm [shape: f32[1,8,128], index: 3, kind: output, shape index: {}]  }
   0x1   :  { %s203_s14 = scalar_lea.hbm %s367_s0, 16 }
   0x2   :  { %p204_p0 = scmp.ne.s32.totalorder %s367_s0, %s203_s14  ;;  %p207_p1 = scmp.lt.u32.totalorder %s203_s14, %s367_s0 }
   0x4   :  { %p209_p2 = pnand %p207_p1, %p204_p0 }
   0x6   :  { %212 = shalt.err (!%p209_p2)  }
   0x7   :  { %s287_s19 = smov [#allocation3]  }
   0x8   :  { %9 = dma.hbm_to_smem %s367_s0, 16, %s287_s19, [#allocation2] }
   0x9   :  { %279 = dma.done.wait [#allocation2], 16 }
   0xa   :  { %280 = vsyncadd [#allocation2], 4294967280 }
   0xb   :  { %11 = sfence }
   0xc   :  { %12 = vsyncpa [#allocation5], 0 }
   0xd   :  { %13 = vsyncpa [#allocation8], 0 }
   0xe   :  { %14 = vsyncpa [#allocation6], 0  ;;  %s288_s22 = smov [#allocation4]   ;;  %s213_s26 = scalar_lea.hbm %s368_s1, 256 }
   0xf   :  { %s26_s23 = sshll.u32 %s288_s22, 4  ;;  %p214_p3 = scmp.ne.s32.totalorder %s368_s1, %s213_s26  ;;  %s27_s23 = int_to_ptr.vmem [resolvable:$true] %s26_s23 }
  0x10   :  { %p217_p4 = scmp.lt.u32.totalorder %s213_s26, %s368_s1 }
  0x12   :  { %p219_p5 = pnand %p217_p4, %p214_p3 }
  0x14   :  { %222 = shalt.err (!%p219_p5)
}
  0x15   :  { %s223_s0 = scalar_lea.vmem %s27_s23, 256  ;;  %p228_p7 = scmp.lt.s32.totalorder %s27_s23, %s27_s23 }
  0x16   :  { %p224_p6 = scmp.ne.s32.totalorder %s27_s23, %s223_s0  ;;  %p229_p8 = scmp.lt.s32.totalorder %s223_s0, %s223_s0 }
  0x18   :  { %p230_p9 = por %p229_p8, %p228_p7 }
  0x1a   :  { %p231_p10 = pnand %p230_p9, %p224_p6 }
  0x1c   :  { %234 = shalt.err (!%p231_p10)
}
  0x1d   :  { %s289_s4 = smov 128   ;;  %s290_s5 = smov 8  }
  0x1e   :  { %32 = dma.hbm_to_vmem [thread:$0]  %s368_s1, 256, %s27_s23, [#allocation5], %s289_s4, %s289_s4, %s290_s5  }
  0x1f   :  { %s291_s8 = smov [#allocation7]   ;;  %s235_s12 = scalar_lea.hbm %s369_s2, 256 }
  0x20   :  { %s44_s9 = sshll.u32 %s291_s8, 4  ;;  %p236_p11 = scmp.ne.s32.totalorder %s369_s2, %s235_s12  ;;  %s45_s9 = int_to_ptr.vmem [resolvable:$true] %s44_s9 }
  0x21   :  { %p239_p12 = scmp.lt.u32.totalorder %s235_s12, %s369_s2 }
  0x23   :  { %p241_p13 = pnand %p239_p12, %p236_p11 }
  0x25   :  { %244 = shalt.err (!%p241_p13)
}
  0x26   :  { %s245_s17 = scalar_lea.vmem %s45_s9, 256  ;;  %p250_p1 = scmp.lt.s32.totalorder %s45_s9, %s45_s9 }
  0x27   :  { %p246_p0 = scmp.ne.s32.totalorder %s45_s9, %s245_s17  ;;  %p251_p2 = scmp.lt.s32.totalorder %s245_s17, %s245_s17 }
  0x29   :  { %p252_p3 = por %p251_p2, %p250_p1 }
  0x2b   :  { %p253_p4 = pnand %p252_p3, %p246_p0 }
  0x2d   :  { %256 = shalt.err (!%p253_p4)
}
  0x2e   :  { %50 = dma.hbm_to_vmem [thread:$0]  %s369_s2, 256, %s45_s9, [#allocation8], %s289_s4, %s289_s4, %s290_s5  }
  0x2f   :  { %281 = dma.done.wait [#allocation5], 256  }
  0x30   :  { %282 = vsyncadd [#allocation5], 4294967040 }
  0x31   :  { %283 = dma.done.wait [#allocation8], 256  }
  0x32   :  { %284 = vsyncadd [#allocation8], 4294967040  ;;  %s123_s19 = sld [smem:[#allocation3]]  ;;  %s179_s20 = sld [smem:[#allocation3 + $0x1]]  ;;  %v292_v0 = vmov 0.0   ;;  %v70_v1 = vld [vmem:[#allocation4] sm:$0xff] }
  0x33   :  { %69 = vst [vmem:[#allocation9] sm:$0xff] %v292_v0  ;;  %v71_v2 = vld [vmem:[#allocation4 + $0x8] sm:$0xff]  ;;  %v74_v3 = vand.u32 2147483647, %v70_v1  ;;  %v72_v15 = vld [vmem:[#allocation7] sm:$0xff]  ;;  %v73_v16 = vld [vmem:[#allocation7 + $0x8] sm:$0xff] }
  0x34   :  { %v75_v4 = vand.u32 2147483647, %v71_v2  ;;  %v82_v18 = vmul.f32 %v72_v15, %v70_v1  ;;  %v84_v19 = vmax.f32 %v70_v1, 0.0  ;;  %v83_v22 = vmul.f32 %v73_v16, %v71_v2 }
  0x35   :  { %v76_v5 = vsub.f32 0.0, %v74_v3  ;;  %v85_v23 = vmax.f32 %v71_v2, 0.0 }
  0x36   :  { %v77_v6 = vsub.f32 0.0, %v75_v4  ;;  %v86_v27 = vsub.f32 %v84_v19, %v82_v18 }
  0x37   :  { %v78_v7 = vmul.f32 1.442695, %v76_v5  ;;  %v87_v30 = vsub.f32 %v85_v23, %v83_v22 }
  0x38   :  { %p180_p5 = scmp.gt.s32.totalorder %s123_s19, 0  ;;  %p181_p6 = scmp.eq.s32.totalorder %s123_s19, 0  ;;  %v80_v8 = vmul.f32 1.442695, %v77_v6 }
  0x39   :  { %191 = vpow2.f32 %v78_v7 }
  0x3a   :  { %s372_s20 = smov (!%p181_p6, %s179_s20), 0  ;;  %193 = vpow2.f32 %v80_v8 }
  0x3b   :  { %s374_s20 = smov (%p180_p5, %s372_s20), 2048 }
  0x3c   :  { %p182_p7 = scmp.ne.s32.totalorder %s374_s20, 2048 }
  0x3d   :  { %v134_v52 = vld [vmem:[#allocation9] sm:$0xff] (!%p182_p7) }
  0x43   :  { %v192_v9 = vpop.eup %191 }
  0x44   :  { %v194_v10 = vpop.eup %193  ;;  %v88_v11 = vadd.f32 1.0, %v192_v9  ;;  %v91_v13 = vmul.f32 -0.5, %v192_v9  ;;  %v94_v20 = vand.u32 2147483647, %v192_v9 }
  0x45   :  { %v97_v12 = vadd.f32 1.0, %v194_v10  ;;  %v100_v14 = vmul.f32 -0.5, %v194_v10  ;;  %v103_v24 = vand.u32 2147483647, %v194_v10 }
  0x46   :  { %195 = vlog2.f32 %v88_v11  ;;  %v92_v17 = vadd.f32 1.0, %v91_v13  ;;  %vm95_vm0 = vcmp.lt.f32.partialorder %v94_v20, 0.0004427343 }
  0x47   :  { %197 = vlog2.f32 %v97_v12  ;;  %v101_v21 = vadd.f32 1.0, %v100_v14  ;;  %vm104_vm1 = vcmp.lt.f32.partialorder %v103_v24, 0.0004427343 }
  0x48   :  { %v93_v25 = vmul.f32 %v192_v9, %v92_v17 }
  0x49   :  { %v102_v28 = vmul.f32 %v194_v10, %v101_v21 }
  0x50   :  { %v196_v26 = vpop.eup %195 }
  0x51   :  { %v198_v29 = vpop.eup %197  ;;  %v90_v31 = vmul.f32 0.6931472, %v196_v26 }
  0x52   :  { %v99_v32 = vmul.f32 0.6931472, %v198_v29 }
  0x53   :  { %v96_v33 = vsel %vm95_vm0, %v93_v25, %v90_v31 }
  0x54   :  { %v105_v34 = vsel %vm104_vm1, %v102_v28, %v99_v32  ;;  %v106_v35 = vadd.f32 %v96_v33, %v86_v27 }
  0x55   :  { %v107_v36 = vadd.f32 %v105_v34, %v87_v30 }
  0x56   :  { %v108_v37 = vsub.f32 0.0, %v106_v35 }
  0x57   :  { %v109_v38 = vsub.f32 0.0, %v107_v36 }
  0x58   :  { %v110_v39 = vmul.f32 1.442695, %v108_v37 }
  0x59   :  { %v112_v40 = vmul.f32 1.442695, %v109_v38 }
  0x5a   :  { %199 = vpow2.f32 %v110_v39 }
  0x5b   :  { %201 = vpow2.f32 %v112_v40 }
  0x64   :  { %v200_v41 = vpop.eup %199 }
  0x65   :  { %v202_v42 = vpop.eup %201  ;;  %v114_v43 = vsub.f32 1.0, %v200_v41 }
  0x66   :  { %v115_v44 = vsub.f32 1.0, %v202_v42  ;;  %132 = sbr.rel (%p182_p7) target bundleno = 115 (0x73), region = 25 }
  0x67   :  { %v116_v45 = vmul.f32 %v114_v43, %v114_v43 }
  0x68   :  { %v117_v46 = vmul.f32 %v115_v44, %v115_v44 }
  0x69   :  { %v118_v47 = vmul.f32 0.25, %v116_v45 }
  0x6a   :  { %v119_v48 = vmul.f32 0.25, %v117_v46 }
  0x6b   :  { %v120_v49 = vmul.f32 %v118_v47, %v106_v35 }
  0x6c   :  { %v121_v50 = vmul.f32 %v119_v48, %v107_v36 }
  0x6e   :  { %v133_v51 = vadd.f32 %v121_v50, %v120_v49 }
  0x70   :  { %v135_v53 = vadd.f32 %v134_v52, %v133_v51 }
  0x72   :  { %136 = vst [vmem:[#allocation9] sm:$0xff] %v135_v53 }
  0x73 PF:  { %p183_p8 = scmp.ge.s32.totalorder %s374_s20, 2048 }
  0x74   :  { %v141_v54 = vlaneseq (!%p183_p8)  ;;  %v150_v59 = vstv (!%p183_p8), %s374_s20 }
  0x75   :  { %140 = sbr.rel (%p183_p8) target bundleno = 133 (0x85), region = 29 }
  0x76   :  { %v142_v55 = vshrl.u32 (!%p183_p8), %v141_v54, 7  ;;  %v145_v56 = vand.u32 (!%p183_p8), 127, %v141_v54 }
  0x78   :  { %v143_v57 = vadd.s32 (!%p183_p8), 8, %v142_v55  ;;  %v146_v58 = vmul.u32 (!%p183_p8), 128, %v142_v55 }
  0x79   :  { %v156_v1 = vld [vmem:[#allocation9] sm:$0xff] (!%p183_p8) }
  0x7a   :  { %v147_v60 = vmul.u32 (!%p183_p8), 128, %v143_v57  ;;  %v148_v61 = vadd.s32 (!%p183_p8), %v146_v58, %v145_v56 }
  0x7c   :  { %v149_v62 = vadd.s32 %v147_v60, %v145_v56  ;;  %vm151_vm2 = vcmp.lt.s32.totalorder %v148_v61, %v150_v59 }
  0x7d   :  { %v153_v63 = vsel %vm151_vm2, %v120_v49, 0.0 }
  0x7e   :  { %vm152_vm3 = vcmp.lt.s32.totalorder %v149_v62, %v150_v59 }
  0x7f   :  { %v154_v0 = vsel %vm152_vm3, %v121_v50, 0.0 }
  0x80   :  { %v155_v2 = vadd.f32 %v154_v0, %v153_v63 }
  0x82   :  { %v157_v3 = vadd.f32 %v156_v1, %v155_v2 }
  0x84   :  { %158 = vst [vmem:[#allocation9] sm:$0xff] %v157_v3 }
  0x85 PF:  { %s293_s2 = smov [#allocation9]  }
  0x86   :  { %s165_s21 = sshll.u32 %s293_s2, 4  ;;  %s166_s21 = int_to_ptr.vmem [resolvable:$true] %s165_s21 }
  0x87   :  { %s257_s22 = scalar_lea.vmem %s166_s21, 128  ;;  %p262_p10 = scmp.lt.s32.totalorder %s166_s21, %s166_s21 }
  0x88   :  { %p258_p9 = scmp.ne.s32.totalorder %s166_s21, %s257_s22  ;;  %p263_p11 = scmp.lt.s32.totalorder %s257_s22, %s257_s22 }
  0x8a   :  { %p264_p12 = por %p263_p11, %p262_p10 }
  0x8c   :  { %p265_p13 = pnand %p264_p12, %p258_p9 }
  0x8e   :  { %268 = shalt.err (!%p265_p13)
}
  0x8f   :  { %s269_s25 = scalar_lea.hbm %s370_s3, 128 }
  0x90   :  { %p270_p0 = scmp.ne.s32.totalorder %s370_s3, %s269_s25  ;;  %p273_p1 = scmp.lt.u32.totalorder %s269_s25, %s370_s3 }
  0x92   :  { %p275_p2 = pnand %p273_p1, %p270_p0 }
  0x94   :  { %278 = shalt.err (!%p275_p2)
}
  0x95   :  { %168 = dma.vmem_to_hbm [thread:$0]  %s166_s21, 128, %s370_s3, [#allocation6]  }
  0x96   :  { %285 = dma.done.wait [#allocation6], 128  }
  0x97   :  { %286 = vsyncadd [#allocation6], 4294967168 }
  0x98   :  { %172 = vsyncpa [#allocation5], 1 }
  0x99   :  { %173 = vsyncpa [#allocation8], 1 }
  0x9a   :  { %174 = vsyncpa [#allocation6], 1 }

</bundles_post_ra>
